<compile_context>
chip_gen: v7x
topology: tpu7x:2x2x1
jax: 0.10.0
libtpu: 0.0.40
codegen_flags: <defaults>
</compile_context>

<pallas_src>
import jax
import jax.numpy as jnp
from jax.experimental import pallas as pl
from jax.experimental.pallas import tpu as pltpu

F32 = jnp.float32


def _dot(a, b):
    return jnp.dot(a, b, preferred_element_type=F32)


# ----------------------------- encoder kernel ------------------------------
def encoder_kernel(static_ref, A_ref, Ws_ref, wx_ref, Wig_ref, Wh_ref,
                   bproj_ref, bhn_wfc_ref, bfc_ref,
                   hn_out, xn_out):
    """One (batch b, time t) grid step of the encoder.

    static_ref : (C, Fs)   per-step node features (y_t, X_t[:, :-1], emb)
    A_ref      : (C, C)    adj.T   (aggr_i = sum_j A[j, i] * x_j)
    Ws_ref     : (Fs, 5H)  [Wrel_s | Wroot_s | Wi_s]      (rows for `s`)
    wx_ref     : (1, 5H)   [Wrel_x | Wroot_x | Wi_x]      (row for `xn`)
    Wig_ref    : (H, 3H)   GRU input weights for the x_gcn rows
    Wh_ref     : (H, 3H)   GRU hidden weights [Whr | Whz | Whn]
    bproj_ref  : (1, 5H)   [0 | brel | bir+bhr | biz+bhz | bin]
    bhn_wfc_ref: (1, 2H)   [bhn | fc_out weight row]
    bfc_ref    : (1, 1)    fc_out bias
    hn_out     : (C, H)    carried GRU state   (per-batch output block)
    xn_out     : (C, 1)    carried fc_out value (per-batch output block)
    """
    t = pl.program_id(1)
    H = hn_out.shape[-1]

    @pl.when(t == 0)
    def _():
        hn_out[...] = jnp.zeros_like(hn_out)
        xn_out[...] = jnp.zeros_like(xn_out)

    s = static_ref[...]                                   # (C, Fs)
    xn = xn_out[...]                                      # (C, 1)
    hn = hn_out[...]                                      # (C, H)

    # All `s`/`xn` projections in one wide matmul + one rank-1 broadcast.
    proj = _dot(s, Ws_ref[...]) + xn * wx_ref[...] + bproj_ref[...]   # (C, 5H)
    rel = proj[:, 0 * H:1 * H]                            # x @ Wrel           (no bias)
    root = proj[:, 1 * H:2 * H]                           # x @ Wroot + brel
    gi = proj[:, 2 * H:5 * H]                             # x @ Wi + fused biases

    # GraphConv + sigmoid:  (A@x)@Wrel + brel + x@Wroot  ==  A@rel + root
    x_gcn = jax.nn.sigmoid(_dot(A_ref[...], rel) + root)  # (C, H)

    # Fused-gate GRU.
    gi = gi + _dot(x_gcn, Wig_ref[...])                   # (C, 3H)
    gh = _dot(hn, Wh_ref[...])                            # (C, 3H)
    bhn = bhn_wfc_ref[:, 0:H]
    wfc = bhn_wfc_ref[:, H:2 * H]

    r = jax.nn.sigmoid(gi[:, 0:H] + gh[:, 0:H])
    z = jax.nn.sigmoid(gi[:, H:2 * H] + gh[:, H:2 * H])
    n = jnp.tanh(gi[:, 2 * H:3 * H] + r * (gh[:, 2 * H:3 * H] + bhn))
    hn_new = (1.0 - z) * n + z * hn

    # fc_out as a lane reduction instead of a 1-wide MXU matmul.
    xn_new = jnp.sum(hn_new * wfc, axis=-1, keepdims=True) + bfc_ref[...]

    hn_out[...] = hn_new
    xn_out[...] = xn_new


# ----------------------------- decoder kernel ------------------------------
def decoder_kernel(emb_ref, hn0_ref, xn0_ref,
                   Wie_ref, wix_ref, Wh_ref, bvec_ref, bfc_ref,
                   preds_ref, hn_sc, xn_sc):
    """One (batch b, time t) grid step of the decoder.

    emb_ref  : (C, E)    spatial embedding for this step
    hn0_ref  : (C, H)    encoder final GRU state (read at t == 0)
    xn0_ref  : (C, 1)    encoder final fc_out value (read at t == 0)
    Wie_ref  : (E, 3H)   GRU input weights for the emb rows
    wix_ref  : (1, 3H)   GRU input weight row for xn
    Wh_ref   : (H, 3H)   GRU hidden weights
    bvec_ref : (1, 5H)   [bir+bhr | biz+bhz | bin | bhn | fc_out weight row]
    bfc_ref  : (1, 1)    fc_out bias
    preds_ref: (C, 1)    per-(b, t) prediction block
    hn_sc    : (C, H)    VMEM scratch GRU state (carried over t)
    xn_sc    : (C, 1)    VMEM scratch fc_out value (carried over t)
    """
    t = pl.program_id(1)
    H = hn_sc.shape[-1]

    @pl.when(t == 0)
    def _():
        hn_sc[...] = hn0_ref[...]
        xn_sc[...] = xn0_ref[...]

    hn = hn_sc[...]
    xn = xn_sc[...]

    gi = _dot(emb_ref[...], Wie_ref[...]) + xn * wix_ref[...] + bvec_ref[:, 0:3 * H]
    gh = _dot(hn, Wh_ref[...])
    bhn = bvec_ref[:, 3 * H:4 * H]
    wfc = bvec_ref[:, 4 * H:5 * H]

    r = jax.nn.sigmoid(gi[:, 0:H] + gh[:, 0:H])
    z = jax.nn.sigmoid(gi[:, H:2 * H] + gh[:, H:2 * H])
    n = jnp.tanh(gi[:, 2 * H:3 * H] + r * (gh[:, 2 * H:3 * H] + bhn))
    hn_new = (1.0 - z) * n + z * hn
    xn_new = jnp.sum(hn_new * wfc, axis=-1, keepdims=True) + bfc_ref[...]

    hn_sc[...] = hn_new
    xn_sc[...] = xn_new
    preds_ref[...] = xn_new


# ------------------------------- JAX glue ----------------------------------
def _const_spec(shape):
    n = len(shape)
    return pl.BlockSpec(shape, lambda b, t, _n=n: (0,) * _n)


def _pack_gru(gru):
    """Fuse per-gate GRU params into packed arrays (PyTorch gate order r,z,n)."""
    Wi = jnp.concatenate([gru["Wir"], gru["Wiz"], gru["Win"]], axis=1)   # (in, 3H)
    Wh = jnp.concatenate([gru["Whr"], gru["Whz"], gru["Whn"]], axis=1)   # (H, 3H)
    bi = jnp.concatenate([gru["bir"] + gru["bhr"],
                          gru["biz"] + gru["bhz"],
                          gru["bin"]], axis=1)                           # (1, 3H)
    return Wi, Wh, bi, gru["bhn"]


def init_params(key, cfg):
    E, H, C = cfg["emb_dim"], cfg["hid_dim"], cfg["city_num"]
    NE = cfg["num_embeddings"]
    Ft_enc = (cfg["in_dim_enc"] - 1) + E + 2     # GraphConv / GRU "x" features
    Fg_enc = Ft_enc + H                          # encoder GRU input size
    Fg_dec = E + 1                               # decoder GRU input size

    keys = iter(jax.random.split(key, 64))

    def w(shape, scale=0.1):
        return (scale * jax.random.normal(next(keys), shape)).astype(F32)

    def gru(in_dim):
        p = {}
        for g in ("r", "z", "n"):
            p[f"Wi{g}"] = w((in_dim, H))
            p[f"bi{g}"] = w((1, H))
            p[f"Wh{g}"] = w((H, H))
            p[f"bh{g}"] = w((1, H))
        return p

    return {
        "enc_emb": w((NE, E), 0.5),
        "adj": jax.random.uniform(next(keys), (C, C), dtype=F32),   # edge weights
        "Wrel": w((Ft_enc, H)), "brel": w((1, H)), "Wroot": w((Ft_enc, H)),
        "enc_gru": gru(Fg_enc),
        "enc_Wfc": w((H, 1)), "enc_bfc": w((1, 1)),
        "dec_emb": w((NE, E), 0.5),
        "dec_gru": gru(Fg_dec),
        "dec_Wfc": w((H, 1)), "dec_bfc": w((1, 1)),
    }


def graphconv_gru_forward(X, y, params, cfg):
    B, _, C, _ = X.shape
    hist_len, forecast_len = cfg["hist_len"], cfg["forecast_len"]
    H = cfg["hid_dim"]
    N = B * C
    idx = X[..., -1].astype(jnp.int32)                          # (B, T, C)

    vmem = 32 * 1024 * 1024

    # ---------------- encoder ----------------
    # TODO(synk): the embedding-table gather and sparse edge_index->dense (C,C)
    # adjacency conversion stay as host-side JAX glue; all hot-path math
    # (GraphConv, GRU, fc_out) is inside the Pallas kernels.
    emb_enc = params["enc_emb"][idx[:, :hist_len]]              # (B, Th, C, E)
    static = jnp.concatenate(
        [y[:, :hist_len], X[:, :hist_len, :, :-1], emb_enc], axis=-1)   # (B, Th, C, Fs)
    Fs = static.shape[-1]

    # aggregation at node i sums A[j, i] * x_j (source->target), hence adj.T;
    # applied per batch block inside the kernel (no dense block-diagonal kron).
    At = params["adj"].T.astype(F32)                            # (C, C)

    Wi, Wh, bi, bhn = _pack_gru(params["enc_gru"])
    Wi_x, Wi_s, Wi_g = Wi[0:1], Wi[1:1 + Fs], Wi[1 + Fs:]
    Wrel_x, Wrel_s = params["Wrel"][0:1], params["Wrel"][1:]
    Wroot_x, Wroot_s = params["Wroot"][0:1], params["Wroot"][1:]

    Ws_pack = jnp.concatenate([Wrel_s, Wroot_s, Wi_s], axis=1)          # (Fs, 5H)
    wx_pack = jnp.concatenate([Wrel_x, Wroot_x, Wi_x], axis=1)          # (1, 5H)
    bproj = jnp.concatenate(
        [jnp.zeros((1, H), F32), params["brel"], bi], axis=1)           # (1, 5H)
    bhn_wfc = jnp.concatenate([bhn, params["enc_Wfc"].T], axis=1)       # (1, 2H)
    bfc = params["enc_bfc"]                                             # (1, 1)

    enc_args = [At, Ws_pack, wx_pack, Wi_g, Wh, bproj, bhn_wfc, bfc]
    in_specs = [pl.BlockSpec((pl.Squeezed(), pl.Squeezed(), C, Fs),
                             lambda b, t: (b, t, 0, 0))]
    in_specs += [_const_spec(a.shape) for a in enc_args]

    hn, xn = pl.pallas_call(
        encoder_kernel,
        out_shape=(jax.ShapeDtypeStruct((N, H), F32),
                   jax.ShapeDtypeStruct((N, 1), F32)),
        grid_spec=pltpu.PrefetchScalarGridSpec(
            num_scalar_prefetch=0,
            grid=(B, hist_len),
            in_specs=in_specs,
            out_specs=[pl.BlockSpec((C, H), lambda b, t: (b, 0)),
                       pl.BlockSpec((C, 1), lambda b, t: (b, 0))]),
        compiler_params=pltpu.CompilerParams(
            dimension_semantics=("parallel", "arbitrary"),
            vmem_limit_bytes=vmem),
    )(static, *enc_args)

    # ---------------- decoder ----------------
    # NOTE: the reference Decoder indexes X[:, i] for i in range(forecast_len),
    # i.e. it intentionally re-uses the FIRST forecast_len timesteps of X;
    # replicated here on purpose -- do not "fix" during optimization.
    emb_dec = params["dec_emb"][idx[:, :forecast_len]]          # (B, Tf, C, E)
    E = emb_dec.shape[-1]

    Wi_d, Wh_d, bi_d, bhn_d = _pack_gru(params["dec_gru"])
    wix_d, Wie_d = Wi_d[0:1], Wi_d[1:]
    bvec_d = jnp.concatenate([bi_d, bhn_d, params["dec_Wfc"].T], axis=1)  # (1, 5H)
    bfc_d = params["dec_bfc"]                                             # (1, 1)

    dec_weights = [Wie_d, wix_d, Wh_d, bvec_d, bfc_d]
    in_specs_d = [pl.BlockSpec((pl.Squeezed(), pl.Squeezed(), C, E),
                               lambda b, t: (b, t, 0, 0)),
                  pl.BlockSpec((C, H), lambda b, t: (b, 0)),
                  pl.BlockSpec((C, 1), lambda b, t: (b, 0))]
    in_specs_d += [_const_spec(a.shape) for a in dec_weights]

    preds = pl.pallas_call(
        decoder_kernel,
        out_shape=jax.ShapeDtypeStruct((B, forecast_len, C, 1), F32),
        grid_spec=pltpu.PrefetchScalarGridSpec(
            num_scalar_prefetch=0,
            grid=(B, forecast_len),
            in_specs=in_specs_d,
            out_specs=pl.BlockSpec((pl.Squeezed(), pl.Squeezed(), C, 1),
                                   lambda b, t: (b, t, 0, 0)),
            scratch_shapes=[pltpu.VMEM((C, H), F32),
                            pltpu.VMEM((C, 1), F32)]),
        compiler_params=pltpu.CompilerParams(
            dimension_semantics=("parallel", "arbitrary"),
            vmem_limit_bytes=vmem),
    )(emb_dec, hn, xn, *dec_weights)

    return preds                                                 # (B, Tf, C, 1)


# -------------------------- pure-JAX reference -----------------------------
def reference_forward(X, y, params, cfg):
    B, _, C, _ = X.shape
    hist_len, forecast_len, H = cfg["hist_len"], cfg["forecast_len"], cfg["hid_dim"]
    N = B * C
    idx = X[..., -1].astype(jnp.int32)
    A_bd = jnp.kron(jnp.eye(B, dtype=F32), params["adj"].T.astype(F32))
    dot = lambda a, b: jnp.dot(a, b, precision=jax.lax.Precision.HIGHEST)

    def gru(p, x, h):
        r = jax.nn.sigmoid(dot(x, p["Wir"]) + p["bir"] + dot(h, p["Whr"]) + p["bhr"])
        z = jax.nn.sigmoid(dot(x, p["Wiz"]) + p["biz"] + dot(h, p["Whz"]) + p["bhz"])
        n = jnp.tanh(dot(x, p["Win"]) + p["bin"] + r * (dot(h, p["Whn"]) + p["bhn"]))
        return (1 - z) * n + z * h

    hn = jnp.zeros((N, H), F32)
    xn = jnp.zeros((B, C, 1), F32)
    for i in range(hist_len):
        emb = params["enc_emb"][idx[:, i]]
        x = jnp.concatenate([xn, y[:, i], X[:, i, :, :-1], emb], axis=-1)
        xf = x.reshape(N, -1)
        gc = dot(dot(A_bd, xf), params["Wrel"]) + params["brel"] + dot(xf, params["Wroot"])
        xi = jnp.concatenate([xf, jax.nn.sigmoid(gc)], axis=-1)
        hn = gru(params["enc_gru"], xi, hn)
        xn = (dot(hn, params["enc_Wfc"]) + params["enc_bfc"]).reshape(B, C, 1)

    preds = []
    for i in range(forecast_len):
        emb = params["dec_emb"][idx[:, i]]
        x = jnp.concatenate([xn, emb], axis=-1).reshape(N, -1)
        hn = gru(params["dec_gru"], x, hn)
        xn = (dot(hn, params["dec_Wfc"]) + params["dec_bfc"]).reshape(B, C, 1)
        preds.append(xn)
    return jnp.stack(preds, axis=1)


if __name__ == "__main__":
    cfg = dict(in_dim_enc=4, in_dim_dec=4, emb_dim=8, hid_dim=32, city_num=8,
               num_embeddings=10, hist_len=4, forecast_len=3, batch_size=2)

    key = jax.random.PRNGKey(0)
    kp, kx, ki, ky = jax.random.split(key, 4)
    params = init_params(kp, cfg)

    B, C = cfg["batch_size"], cfg["city_num"]
    T = cfg["hist_len"] + cfg["forecast_len"]
    x_cont = jax.random.normal(kx, (B, T, C, cfg["in_dim_enc"] - 1), dtype=F32)
    x_idx = jax.random.randint(ki, (B, T, C, 1), 0, cfg["num_embeddings"]).astype(F32)
    X = jnp.concatenate([x_cont, x_idx], axis=-1)   # last feature = embedding index
    y = jax.random.normal(ky, (B, T, C, 1), dtype=F32)

    preds = jax.jit(lambda X, y: graphconv_gru_forward(X, y, params, cfg))(X, y)
    preds = jax.block_until_ready(preds)

    ref = reference_forward(X, y, params, cfg)
    assert preds.shape == (B, cfg["forecast_len"], C, 1), preds.shape
    if not jnp.allclose(preds, ref, atol=1e-3, rtol=1e-3):
        raise AssertionError(
            f"mismatch, max |diff| = {float(jnp.max(jnp.abs(preds - ref)))}")
    print("KERNEL_OK")
</pallas_src>

<mosaic_0001>
module attributes {stable_mosaic.version = 11 : i64} {
  func.func @encoder_kernel(%arg0: i32, %arg1: i32, %arg2: memref<1x1x8x12xf32, #tpu.memory_space<vmem>>, %arg3: memref<8x8xf32, #tpu.memory_space<vmem>>, %arg4: memref<12x160xf32, #tpu.memory_space<vmem>>, %arg5: memref<1x160xf32, #tpu.memory_space<vmem>>, %arg6: memref<32x96xf32, #tpu.memory_space<vmem>>, %arg7: memref<32x96xf32, #tpu.memory_space<vmem>>, %arg8: memref<1x160xf32, #tpu.memory_space<vmem>>, %arg9: memref<1x64xf32, #tpu.memory_space<vmem>>, %arg10: memref<1x1xf32, #tpu.memory_space<vmem>>, %arg11: memref<8x32xf32, #tpu.memory_space<vmem>>, %arg12: memref<8x1xf32, #tpu.memory_space<vmem>>) attributes {dimension_semantics = [#tpu.dimension_semantics<parallel>, #tpu.dimension_semantics<arbitrary>], iteration_bounds = array<i64: 2, 4>, scalar_prefetch = 0 : i64, scratch_operands = 0 : i64, tpu.core_type = #tpu.core_type<tc>, window_params = [{transform_indices = @transform_0, window_bounds = array<i64: 1, 1, 8, 12>}, {pipeline_mode = #tpu.pipeline_mode<synchronous>, transform_indices = @transform_1, window_bounds = array<i64: 8, 8>}, {pipeline_mode = #tpu.pipeline_mode<synchronous>, transform_indices = @transform_2, window_bounds = array<i64: 12, 160>}, {pipeline_mode = #tpu.pipeline_mode<synchronous>, transform_indices = @transform_3, window_bounds = array<i64: 1, 160>}, {pipeline_mode = #tpu.pipeline_mode<synchronous>, transform_indices = @transform_4, window_bounds = array<i64: 32, 96>}, {pipeline_mode = #tpu.pipeline_mode<synchronous>, transform_indices = @transform_5, window_bounds = array<i64: 32, 96>}, {pipeline_mode = #tpu.pipeline_mode<synchronous>, transform_indices = @transform_6, window_bounds = array<i64: 1, 160>}, {pipeline_mode = #tpu.pipeline_mode<synchronous>, transform_indices = @transform_7, window_bounds = array<i64: 1, 64>}, {pipeline_mode = #tpu.pipeline_mode<synchronous>, transform_indices = @transform_8, window_bounds = array<i64: 1, 1>}, {transform_indices = @transform_9, window_bounds = array<i64: 8, 32>}, {transform_indices = @transform_10, window_bounds = array<i64: 8, 1>}]} {
    %c0_i32 = arith.constant 0 : i32
    %0 = arith.cmpi eq, %arg1, %c0_i32 : i32
    %1 = arith.extui %0 : i1 to i32
    %c0_i32_0 = arith.constant 0 : i32
    %2 = arith.cmpi ne, %1, %c0_i32_0 : i32
    scf.if %2 {
      %cst_37 = arith.constant 0.000000e+00 : f32
      %72 = vector.broadcast %cst_37 : f32 to vector<8x32xf32>
      %c0_38 = arith.constant 0 : index
      %c0_39 = arith.constant 0 : index
      %73 = vector.load %arg11[%c0_38, %c0_39] : memref<8x32xf32, #tpu.memory_space<vmem>>, vector<8x32xf32>
      tpu.vector_store %arg11[%c0_38, %c0_39], %72 {strides = array<i32>} : memref<8x32xf32, #tpu.memory_space<vmem>>, vector<8x32xf32>,
      %cst_40 = arith.constant 0.000000e+00 : f32
      %74 = vector.broadcast %cst_40 : f32 to vector<8x1xf32>
      %c0_41 = arith.constant 0 : index
      %c0_42 = arith.constant 0 : index
      %75 = vector.load %arg12[%c0_41, %c0_42] : memref<8x1xf32, #tpu.memory_space<vmem>>, vector<8x1xf32>
      tpu.vector_store %arg12[%c0_41, %c0_42], %74 {strides = array<i32>} : memref<8x1xf32, #tpu.memory_space<vmem>>, vector<8x1xf32>,
    } else {
    }
    %c0 = arith.constant 0 : index
    %c0_1 = arith.constant 0 : index
    %c0_2 = arith.constant 0 : index
    %c0_3 = arith.constant 0 : index
    %3 = vector.load %arg2[%c0, %c0_1, %c0_2, %c0_3] : memref<1x1x8x12xf32, #tpu.memory_space<vmem>>, vector<1x1x8x12xf32>
    %4 = vector.shape_cast %3 : vector<1x1x8x12xf32> to vector<8x12xf32>
    %c0_4 = arith.constant 0 : index
    %c0_5 = arith.constant 0 : index
    %5 = vector.load %arg12[%c0_4, %c0_5] : memref<8x1xf32, #tpu.memory_space<vmem>>, vector<8x1xf32>
    %c0_6 = arith.constant 0 : index
    %c0_7 = arith.constant 0 : index
    %6 = vector.load %arg11[%c0_6, %c0_7] : memref<8x32xf32, #tpu.memory_space<vmem>>, vector<8x32xf32>
    %c0_8 = arith.constant 0 : index
    %c0_9 = arith.constant 0 : index
    %7 = vector.load %arg4[%c0_8, %c0_9] : memref<12x160xf32, #tpu.memory_space<vmem>>, vector<12x160xf32>
    %cst = arith.constant dense<0.000000e+00> : vector<8x160xf32>
    %8 = tpu.matmul %4, %7, %cst {dimension_numbers = #tpu.dot_dimension_numbers<[1], [0], [0], [1], [0, 0, 1, 1], [], []>} : vector<8x12xf32>, vector<12x160xf32>, vector<8x160xf32> -> vector<8x160xf32>
    %c0_10 = arith.constant 0 : index
    %c0_11 = arith.constant 0 : index
    %9 = vector.load %arg5[%c0_10, %c0_11] : memref<1x160xf32, #tpu.memory_space<vmem>>, vector<1x160xf32>
    %10 = vector.broadcast %5 : vector<8x1xf32> to vector<8x160xf32>
    %11 = vector.broadcast %9 : vector<1x160xf32> to vector<8x160xf32>
    %12 = arith.mulf %10, %11 : vector<8x160xf32>
    %13 = arith.addf %8, %12 : vector<8x160xf32>
    %c0_12 = arith.constant 0 : index
    %c0_13 = arith.constant 0 : index
    %14 = vector.load %arg8[%c0_12, %c0_13] : memref<1x160xf32, #tpu.memory_space<vmem>>, vector<1x160xf32>
    %15 = vector.broadcast %14 : vector<1x160xf32> to vector<8x160xf32>
    %16 = arith.addf %13, %15 : vector<8x160xf32>
    %17 = vector.extract_strided_slice %16 {offsets = [0, 0], sizes = [8, 32], strides = [1, 1]} : vector<8x160xf32> to vector<8x32xf32>
    %18 = vector.extract_strided_slice %16 {offsets = [0, 32], sizes = [8, 32], strides = [1, 1]} : vector<8x160xf32> to vector<8x32xf32>
    %19 = vector.extract_strided_slice %16 {offsets = [0, 64], sizes = [8, 96], strides = [1, 1]} : vector<8x160xf32> to vector<8x96xf32>
    %c0_14 = arith.constant 0 : index
    %c0_15 = arith.constant 0 : index
    %20 = vector.load %arg3[%c0_14, %c0_15] : memref<8x8xf32, #tpu.memory_space<vmem>>, vector<8x8xf32>
    %cst_16 = arith.constant dense<0.000000e+00> : vector<8x32xf32>
    %21 = tpu.matmul %20, %17, %cst_16 {dimension_numbers = #tpu.dot_dimension_numbers<[1], [0], [0], [1], [0, 0, 1, 1], [], []>} : vector<8x8xf32>, vector<8x32xf32>, vector<8x32xf32> -> vector<8x32xf32>
    %22 = arith.addf %21, %18 : vector<8x32xf32>
    %23 = arith.negf %22 : vector<8x32xf32>
    %24 = math.exp %23 : vector<8x32xf32>
    %cst_17 = arith.constant 1.000000e+00 : f32
    %25 = vector.broadcast %cst_17 : f32 to vector<8x32xf32>
    %26 = arith.addf %25, %24 : vector<8x32xf32>
    %27 = arith.divf %25, %26 : vector<8x32xf32>
    %c0_18 = arith.constant 0 : index
    %c0_19 = arith.constant 0 : index
    %28 = vector.load %arg6[%c0_18, %c0_19] : memref<32x96xf32, #tpu.memory_space<vmem>>, vector<32x96xf32>
    %cst_20 = arith.constant dense<0.000000e+00> : vector<8x96xf32>
    %29 = tpu.matmul %27, %28, %cst_20 {dimension_numbers = #tpu.dot_dimension_numbers<[1], [0], [0], [1], [0, 0, 1, 1], [], []>} : vector<8x32xf32>, vector<32x96xf32>, vector<8x96xf32> -> vector<8x96xf32>
    %30 = arith.addf %19, %29 : vector<8x96xf32>
    %c0_21 = arith.constant 0 : index
    %c0_22 = arith.constant 0 : index
    %31 = vector.load %arg7[%c0_21, %c0_22] : memref<32x96xf32, #tpu.memory_space<vmem>>, vector<32x96xf32>
    %cst_23 = arith.constant dense<0.000000e+00> : vector<8x96xf32>
    %32 = tpu.matmul %6, %31, %cst_23 {dimension_numbers = #tpu.dot_dimension_numbers<[1], [0], [0], [1], [0, 0, 1, 1], [], []>} : vector<8x32xf32>, vector<32x96xf32>, vector<8x96xf32> -> vector<8x96xf32>
    %c0_24 = arith.constant 0 : index
    %c0_25 = arith.constant 0 : index
    %33 = vector.load %arg9[%c0_24, %c0_25] : memref<1x64xf32, #tpu.memory_space<vmem>>, vector<1x32xf32>
    %c0_26 = arith.constant 0 : index
    %c32 = arith.constant 32 : index
    %34 = vector.load %arg9[%c0_26, %c32] : memref<1x64xf32, #tpu.memory_space<vmem>>, vector<1x32xf32>
    %35 = vector.extract_strided_slice %30 {offsets = [0, 0], sizes = [8, 32], strides = [1, 1]} : vector<8x96xf32> to vector<8x32xf32>
    %36 = vector.extract_strided_slice %32 {offsets = [0, 0], sizes = [8, 32], strides = [1, 1]} : vector<8x96xf32> to vector<8x32xf32>
    %37 = arith.addf %35, %36 : vector<8x32xf32>
    %38 = arith.negf %37 : vector<8x32xf32>
    %39 = math.exp %38 : vector<8x32xf32>
    %cst_27 = arith.constant 1.000000e+00 : f32
    %40 = vector.broadcast %cst_27 : f32 to vector<8x32xf32>
    %41 = arith.addf %40, %39 : vector<8x32xf32>
    %42 = arith.divf %40, %41 : vector<8x32xf32>
    %43 = vector.extract_strided_slice %30 {offsets = [0, 32], sizes = [8, 32], strides = [1, 1]} : vector<8x96xf32> to vector<8x32xf32>
    %44 = vector.extract_strided_slice %32 {offsets = [0, 32], sizes = [8, 32], strides = [1, 1]} : vector<8x96xf32> to vector<8x32xf32>
    %45 = arith.addf %43, %44 : vector<8x32xf32>
    %46 = arith.negf %45 : vector<8x32xf32>
    %47 = math.exp %46 : vector<8x32xf32>
    %cst_28 = arith.constant 1.000000e+00 : f32
    %48 = vector.broadcast %cst_28 : f32 to vector<8x32xf32>
    %49 = arith.addf %48, %47 : vector<8x32xf32>
    %50 = arith.divf %48, %49 : vector<8x32xf32>
    %51 = vector.extract_strided_slice %30 {offsets = [0, 64], sizes = [8, 32], strides = [1, 1]} : vector<8x96xf32> to vector<8x32xf32>
    %52 = vector.extract_strided_slice %32 {offsets = [0, 64], sizes = [8, 32], strides = [1, 1]} : vector<8x96xf32> to vector<8x32xf32>
    %53 = vector.broadcast %33 : vector<1x32xf32> to vector<8x32xf32>
    %54 = arith.addf %52, %53 : vector<8x32xf32>
    %55 = arith.mulf %42, %54 : vector<8x32xf32>
    %56 = arith.addf %51, %55 : vector<8x32xf32>
    %57 = math.tanh %56 : vector<8x32xf32>
    %cst_29 = arith.constant 1.000000e+00 : f32
    %58 = vector.broadcast %cst_29 : f32 to vector<8x32xf32>
    %59 = arith.subf %58, %50 : vector<8x32xf32>
    %60 = arith.mulf %59, %57 : vector<8x32xf32>
    %61 = arith.mulf %50, %6 : vector<8x32xf32>
    %62 = arith.addf %60, %61 : vector<8x32xf32>
    %63 = vector.broadcast %34 : vector<1x32xf32> to vector<8x32xf32>
    %64 = arith.mulf %62, %63 : vector<8x32xf32>
    %cst_30 = arith.constant dense<0.000000e+00> : vector<8xf32>
    %65 = vector.multi_reduction <add>, %64, %cst_30 [1] : vector<8x32xf32> to vector<8xf32>
    %66 = vector.shape_cast %65 : vector<8xf32> to vector<8x1xf32>
    %c0_31 = arith.constant 0 : index
    %c0_32 = arith.constant 0 : index
    %67 = vector.load %arg10[%c0_31, %c0_32] : memref<1x1xf32, #tpu.memory_space<vmem>>, vector<1x1xf32>
    %68 = vector.broadcast %67 : vector<1x1xf32> to vector<8x1xf32>
    %69 = arith.addf %66, %68 : vector<8x1xf32>
    %c0_33 = arith.constant 0 : index
    %c0_34 = arith.constant 0 : index
    %70 = vector.load %arg11[%c0_33, %c0_34] : memref<8x32xf32, #tpu.memory_space<vmem>>, vector<8x32xf32>
    tpu.vector_store %arg11[%c0_33, %c0_34], %62 {strides = array<i32>} : memref<8x32xf32, #tpu.memory_space<vmem>>, vector<8x32xf32>,
    %c0_35 = arith.constant 0 : index
    %c0_36 = arith.constant 0 : index
    %71 = vector.load %arg12[%c0_35, %c0_36] : memref<8x1xf32, #tpu.memory_space<vmem>>, vector<8x1xf32>
    tpu.vector_store %arg12[%c0_35, %c0_36], %69 {strides = array<i32>} : memref<8x1xf32, #tpu.memory_space<vmem>>, vector<8x1xf32>,
    return
  }
  func.func @transform_0(%arg0: i32, %arg1: i32) -> (i32, i32, i32, i32) {
    %c0_i32 = arith.constant 0 : i32
    %c0_i32_0 = arith.constant 0 : i32
    %c0_i32_1 = arith.constant 0 : i32
    return %arg0, %arg1, %c0_i32, %c0_i32_0 : i32, i32, i32, i32
  }
  func.func @transform_1(%arg0: i32, %arg1: i32) -> (i32, i32) {
    %c0_i32 = arith.constant 0 : i32
    %c0_i32_0 = arith.constant 0 : i32
    %c0_i32_1 = arith.constant 0 : i32
    return %c0_i32, %c0_i32_0 : i32, i32
  }
  func.func @transform_2(%arg0: i32, %arg1: i32) -> (i32, i32) {
    %c0_i32 = arith.constant 0 : i32
    %c0_i32_0 = arith.constant 0 : i32
    %c0_i32_1 = arith.constant 0 : i32
    return %c0_i32, %c0_i32_0 : i32, i32
  }
  func.func @transform_3(%arg0: i32, %arg1: i32) -> (i32, i32) {
    %c0_i32 = arith.constant 0 : i32
    %c0_i32_0 = arith.constant 0 : i32
    %c0_i32_1 = arith.constant 0 : i32
    return %c0_i32, %c0_i32_0 : i32, i32
  }
  func.func @transform_4(%arg0: i32, %arg1: i32) -> (i32, i32) {
    %c0_i32 = arith.constant 0 : i32
    %c0_i32_0 = arith.constant 0 : i32
    %c0_i32_1 = arith.constant 0 : i32
    return %c0_i32, %c0_i32_0 : i32, i32
  }
  func.func @transform_5(%arg0: i32, %arg1: i32) -> (i32, i32) {
    %c0_i32 = arith.constant 0 : i32
    %c0_i32_0 = arith.constant 0 : i32
    %c0_i32_1 = arith.constant 0 : i32
    return %c0_i32, %c0_i32_0 : i32, i32
  }
  func.func @transform_6(%arg0: i32, %arg1: i32) -> (i32, i32) {
    %c0_i32 = arith.constant 0 : i32
    %c0_i32_0 = arith.constant 0 : i32
    %c0_i32_1 = arith.constant 0 : i32
    return %c0_i32, %c0_i32_0 : i32, i32
  }
  func.func @transform_7(%arg0: i32, %arg1: i32) -> (i32, i32) {
    %c0_i32 = arith.constant 0 : i32
    %c0_i32_0 = arith.constant 0 : i32
    %c0_i32_1 = arith.constant 0 : i32
    return %c0_i32, %c0_i32_0 : i32, i32
  }
  func.func @transform_8(%arg0: i32, %arg1: i32) -> (i32, i32) {
    %c0_i32 = arith.constant 0 : i32
    %c0_i32_0 = arith.constant 0 : i32
    %c0_i32_1 = arith.constant 0 : i32
    return %c0_i32, %c0_i32_0 : i32, i32
  }
  func.func @transform_9(%arg0: i32, %arg1: i32) -> (i32, i32) {
    %c0_i32 = arith.constant 0 : i32
    %c0_i32_0 = arith.constant 0 : i32
    return %arg0, %c0_i32 : i32, i32
  }
  func.func @transform_10(%arg0: i32, %arg1: i32) -> (i32, i32) {
    %c0_i32 = arith.constant 0 : i32
    %c0_i32_0 = arith.constant 0 : i32
    return %arg0, %c0_i32 : i32, i32
  }
}

module attributes {stable_mosaic.version = 11 : i64} {
  func.func @decoder_kernel(%arg0: i32, %arg1: i32, %arg2: memref<1x1x8x8xf32, #tpu.memory_space<vmem>>, %arg3: memref<8x32xf32, #tpu.memory_space<vmem>>, %arg4: memref<8x1xf32, #tpu.memory_space<vmem>>, %arg5: memref<8x96xf32, #tpu.memory_space<vmem>>, %arg6: memref<1x96xf32, #tpu.memory_space<vmem>>, %arg7: memref<32x96xf32, #tpu.memory_space<vmem>>, %arg8: memref<1x160xf32, #tpu.memory_space<vmem>>, %arg9: memref<1x1xf32, #tpu.memory_space<vmem>>, %arg10: memref<1x1x8x1xf32, #tpu.memory_space<vmem>>, %arg11: memref<8x32xf32, #tpu.memory_space<vmem>>, %arg12: memref<8x1xf32, #tpu.memory_space<vmem>>) attributes {dimension_semantics = [#tpu.dimension_semantics<parallel>, #tpu.dimension_semantics<arbitrary>], iteration_bounds = array<i64: 2, 3>, scalar_prefetch = 0 : i64, scratch_operands = 2 : i64, tpu.core_type = #tpu.core_type<tc>, window_params = [{transform_indices = @transform_0, window_bounds = array<i64: 1, 1, 8, 8>}, {transform_indices = @transform_1, window_bounds = array<i64: 8, 32>}, {transform_indices = @transform_2, window_bounds = array<i64: 8, 1>}, {pipeline_mode = #tpu.pipeline_mode<synchronous>, transform_indices = @transform_3, window_bounds = array<i64: 8, 96>}, {pipeline_mode = #tpu.pipeline_mode<synchronous>, transform_indices = @transform_4, window_bounds = array<i64: 1, 96>}, {pipeline_mode = #tpu.pipeline_mode<synchronous>, transform_indices = @transform_5, window_bounds = array<i64: 32, 96>}, {pipeline_mode = #tpu.pipeline_mode<synchronous>, transform_indices = @transform_6, window_bounds = array<i64: 1, 160>}, {pipeline_mode = #tpu.pipeline_mode<synchronous>, transform_indices = @transform_7, window_bounds = array<i64: 1, 1>}, {transform_indices = @transform_8, window_bounds = array<i64: 1, 1, 8, 1>}]} {
    %c0_i32 = arith.constant 0 : i32
    %0 = arith.cmpi eq, %arg1, %c0_i32 : i32
    %1 = arith.extui %0 : i1 to i32
    %c0_i32_0 = arith.constant 0 : i32
    %2 = arith.cmpi ne, %1, %c0_i32_0 : i32
    scf.if %2 {
      %c0_33 = arith.constant 0 : index
      %c0_34 = arith.constant 0 : index
      %61 = vector.load %arg3[%c0_33, %c0_34] : memref<8x32xf32, #tpu.memory_space<vmem>>, vector<8x32xf32>
      %c0_35 = arith.constant 0 : index
      %c0_36 = arith.constant 0 : index
      %62 = vector.load %arg11[%c0_35, %c0_36] : memref<8x32xf32, #tpu.memory_space<vmem>>, vector<8x32xf32>
      tpu.vector_store %arg11[%c0_35, %c0_36], %61 {strides = array<i32>} : memref<8x32xf32, #tpu.memory_space<vmem>>, vector<8x32xf32>,
      %c0_37 = arith.constant 0 : index
      %c0_38 = arith.constant 0 : index
      %63 = vector.load %arg4[%c0_37, %c0_38] : memref<8x1xf32, #tpu.memory_space<vmem>>, vector<8x1xf32>
      %c0_39 = arith.constant 0 : index
      %c0_40 = arith.constant 0 : index
      %64 = vector.load %arg12[%c0_39, %c0_40] : memref<8x1xf32, #tpu.memory_space<vmem>>, vector<8x1xf32>
      tpu.vector_store %arg12[%c0_39, %c0_40], %63 {strides = array<i32>} : memref<8x1xf32, #tpu.memory_space<vmem>>, vector<8x1xf32>,
    } else {
    }
    %c0 = arith.constant 0 : index
    %c0_1 = arith.constant 0 : index
    %3 = vector.load %arg11[%c0, %c0_1] : memref<8x32xf32, #tpu.memory_space<vmem>>, vector<8x32xf32>
    %c0_2 = arith.constant 0 : index
    %c0_3 = arith.constant 0 : index
    %4 = vector.load %arg12[%c0_2, %c0_3] : memref<8x1xf32, #tpu.memory_space<vmem>>, vector<8x1xf32>
    %c0_4 = arith.constant 0 : index
    %c0_5 = arith.constant 0 : index
    %c0_6 = arith.constant 0 : index
    %c0_7 = arith.constant 0 : index
    %5 = vector.load %arg2[%c0_4, %c0_5, %c0_6, %c0_7] : memref<1x1x8x8xf32, #tpu.memory_space<vmem>>, vector<1x1x8x8xf32>
    %6 = vector.shape_cast %5 : vector<1x1x8x8xf32> to vector<8x8xf32>
    %c0_8 = arith.constant 0 : index
    %c0_9 = arith.constant 0 : index
    %7 = vector.load %arg5[%c0_8, %c0_9] : memref<8x96xf32, #tpu.memory_space<vmem>>, vector<8x96xf32>
    %cst = arith.constant dense<0.000000e+00> : vector<8x96xf32>
    %8 = tpu.matmul %6, %7, %cst {dimension_numbers = #tpu.dot_dimension_numbers<[1], [0], [0], [1], [0, 0, 1, 1], [], []>} : vector<8x8xf32>, vector<8x96xf32>, vector<8x96xf32> -> vector<8x96xf32>
    %c0_10 = arith.constant 0 : index
    %c0_11 = arith.constant 0 : index
    %9 = vector.load %arg6[%c0_10, %c0_11] : memref<1x96xf32, #tpu.memory_space<vmem>>, vector<1x96xf32>
    %10 = vector.broadcast %4 : vector<8x1xf32> to vector<8x96xf32>
    %11 = vector.broadcast %9 : vector<1x96xf32> to vector<8x96xf32>
    %12 = arith.mulf %10, %11 : vector<8x96xf32>
    %13 = arith.addf %8, %12 : vector<8x96xf32>
    %c0_12 = arith.constant 0 : index
    %c0_13 = arith.constant 0 : index
    %14 = vector.load %arg8[%c0_12, %c0_13] : memref<1x160xf32, #tpu.memory_space<vmem>>, vector<1x96xf32>
    %15 = vector.broadcast %14 : vector<1x96xf32> to vector<8x96xf32>
    %16 = arith.addf %13, %15 : vector<8x96xf32>
    %c0_14 = arith.constant 0 : index
    %c0_15 = arith.constant 0 : index
    %17 = vector.load %arg7[%c0_14, %c0_15] : memref<32x96xf32, #tpu.memory_space<vmem>>, vector<32x96xf32>
    %cst_16 = arith.constant dense<0.000000e+00> : vector<8x96xf32>
    %18 = tpu.matmul %3, %17, %cst_16 {dimension_numbers = #tpu.dot_dimension_numbers<[1], [0], [0], [1], [0, 0, 1, 1], [], []>} : vector<8x32xf32>, vector<32x96xf32>, vector<8x96xf32> -> vector<8x96xf32>
    %c0_17 = arith.constant 0 : index
    %c96 = arith.constant 96 : index
    %19 = vector.load %arg8[%c0_17, %c96] : memref<1x160xf32, #tpu.memory_space<vmem>>, vector<1x32xf32>
    %c0_18 = arith.constant 0 : index
    %c128 = arith.constant 128 : index
    %20 = vector.load %arg8[%c0_18, %c128] : memref<1x160xf32, #tpu.memory_space<vmem>>, vector<1x32xf32>
    %21 = vector.extract_strided_slice %16 {offsets = [0, 0], sizes = [8, 32], strides = [1, 1]} : vector<8x96xf32> to vector<8x32xf32>
    %22 = vector.extract_strided_slice %18 {offsets = [0, 0], sizes = [8, 32], strides = [1, 1]} : vector<8x96xf32> to vector<8x32xf32>
    %23 = arith.addf %21, %22 : vector<8x32xf32>
    %24 = arith.negf %23 : vector<8x32xf32>
    %25 = math.exp %24 : vector<8x32xf32>
    %cst_19 = arith.constant 1.000000e+00 : f32
    %26 = vector.broadcast %cst_19 : f32 to vector<8x32xf32>
    %27 = arith.addf %26, %25 : vector<8x32xf32>
    %28 = arith.divf %26, %27 : vector<8x32xf32>
    %29 = vector.extract_strided_slice %16 {offsets = [0, 32], sizes = [8, 32], strides = [1, 1]} : vector<8x96xf32> to vector<8x32xf32>
    %30 = vector.extract_strided_slice %18 {offsets = [0, 32], sizes = [8, 32], strides = [1, 1]} : vector<8x96xf32> to vector<8x32xf32>
    %31 = arith.addf %29, %30 : vector<8x32xf32>
    %32 = arith.negf %31 : vector<8x32xf32>
    %33 = math.exp %32 : vector<8x32xf32>
    %cst_20 = arith.constant 1.000000e+00 : f32
    %34 = vector.broadcast %cst_20 : f32 to vector<8x32xf32>
    %35 = arith.addf %34, %33 : vector<8x32xf32>
    %36 = arith.divf %34, %35 : vector<8x32xf32>
    %37 = vector.extract_strided_slice %16 {offsets = [0, 64], sizes = [8, 32], strides = [1, 1]} : vector<8x96xf32> to vector<8x32xf32>
    %38 = vector.extract_strided_slice %18 {offsets = [0, 64], sizes = [8, 32], strides = [1, 1]} : vector<8x96xf32> to vector<8x32xf32>
    %39 = vector.broadcast %19 : vector<1x32xf32> to vector<8x32xf32>
    %40 = arith.addf %38, %39 : vector<8x32xf32>
    %41 = arith.mulf %28, %40 : vector<8x32xf32>
    %42 = arith.addf %37, %41 : vector<8x32xf32>
    %43 = math.tanh %42 : vector<8x32xf32>
    %cst_21 = arith.constant 1.000000e+00 : f32
    %44 = vector.broadcast %cst_21 : f32 to vector<8x32xf32>
    %45 = arith.subf %44, %36 : vector<8x32xf32>
    %46 = arith.mulf %45, %43 : vector<8x32xf32>
    %47 = arith.mulf %36, %3 : vector<8x32xf32>
    %48 = arith.addf %46, %47 : vector<8x32xf32>
    %49 = vector.broadcast %20 : vector<1x32xf32> to vector<8x32xf32>
    %50 = arith.mulf %48, %49 : vector<8x32xf32>
    %cst_22 = arith.constant dense<0.000000e+00> : vector<8xf32>
    %51 = vector.multi_reduction <add>, %50, %cst_22 [1] : vector<8x32xf32> to vector<8xf32>
    %52 = vector.shape_cast %51 : vector<8xf32> to vector<8x1xf32>
    %c0_23 = arith.constant 0 : index
    %c0_24 = arith.constant 0 : index
    %53 = vector.load %arg9[%c0_23, %c0_24] : memref<1x1xf32, #tpu.memory_space<vmem>>, vector<1x1xf32>
    %54 = vector.broadcast %53 : vector<1x1xf32> to vector<8x1xf32>
    %55 = arith.addf %52, %54 : vector<8x1xf32>
    %c0_25 = arith.constant 0 : index
    %c0_26 = arith.constant 0 : index
    %56 = vector.load %arg11[%c0_25, %c0_26] : memref<8x32xf32, #tpu.memory_space<vmem>>, vector<8x32xf32>
    tpu.vector_store %arg11[%c0_25, %c0_26], %48 {strides = array<i32>} : memref<8x32xf32, #tpu.memory_space<vmem>>, vector<8x32xf32>,
    %c0_27 = arith.constant 0 : index
    %c0_28 = arith.constant 0 : index
    %57 = vector.load %arg12[%c0_27, %c0_28] : memref<8x1xf32, #tpu.memory_space<vmem>>, vector<8x1xf32>
    tpu.vector_store %arg12[%c0_27, %c0_28], %55 {strides = array<i32>} : memref<8x1xf32, #tpu.memory_space<vmem>>, vector<8x1xf32>,
    %c0_29 = arith.constant 0 : index
    %c0_30 = arith.constant 0 : index
    %c0_31 = arith.constant 0 : index
    %c0_32 = arith.constant 0 : index
    %58 = vector.load %arg10[%c0_29, %c0_30, %c0_31, %c0_32] : memref<1x1x8x1xf32, #tpu.memory_space<vmem>>, vector<1x1x8x1xf32>
    %59 = vector.shape_cast %58 : vector<1x1x8x1xf32> to vector<8x1xf32>
    %60 = vector.shape_cast %55 : vector<8x1xf32> to vector<1x1x8x1xf32>
    tpu.vector_store %arg10[%c0_29, %c0_30, %c0_31, %c0_32], %60 {strides = array<i32>} : memref<1x1x8x1xf32, #tpu.memory_space<vmem>>, vector<1x1x8x1xf32>,
    return
  }
  func.func @transform_0(%arg0: i32, %arg1: i32) -> (i32, i32, i32, i32) {
    %c0_i32 = arith.constant 0 : i32
    %c0_i32_0 = arith.constant 0 : i32
    %c0_i32_1 = arith.constant 0 : i32
    return %arg0, %arg1, %c0_i32, %c0_i32_0 : i32, i32, i32, i32
  }
  func.func @transform_1(%arg0: i32, %arg1: i32) -> (i32, i32) {
    %c0_i32 = arith.constant 0 : i32
    %c0_i32_0 = arith.constant 0 : i32
    return %arg0, %c0_i32 : i32, i32
  }
  func.func @transform_2(%arg0: i32, %arg1: i32) -> (i32, i32) {
    %c0_i32 = arith.constant 0 : i32
    %c0_i32_0 = arith.constant 0 : i32
    return %arg0, %c0_i32 : i32, i32
  }
  func.func @transform_3(%arg0: i32, %arg1: i32) -> (i32, i32) {
    %c0_i32 = arith.constant 0 : i32
    %c0_i32_0 = arith.constant 0 : i32
    %c0_i32_1 = arith.constant 0 : i32
    return %c0_i32, %c0_i32_0 : i32, i32
  }
  func.func @transform_4(%arg0: i32, %arg1: i32) -> (i32, i32) {
    %c0_i32 = arith.constant 0 : i32
    %c0_i32_0 = arith.constant 0 : i32
    %c0_i32_1 = arith.constant 0 : i32
    return %c0_i32, %c0_i32_0 : i32, i32
  }
  func.func @transform_5(%arg0: i32, %arg1: i32) -> (i32, i32) {
    %c0_i32 = arith.constant 0 : i32
    %c0_i32_0 = arith.constant 0 : i32
    %c0_i32_1 = arith.constant 0 : i32
    return %c0_i32, %c0_i32_0 : i32, i32
  }
  func.func @transform_6(%arg0: i32, %arg1: i32) -> (i32, i32) {
    %c0_i32 = arith.constant 0 : i32
    %c0_i32_0 = arith.constant 0 : i32
    %c0_i32_1 = arith.constant 0 : i32
    return %c0_i32, %c0_i32_0 : i32, i32
  }
  func.func @transform_7(%arg0: i32, %arg1: i32) -> (i32, i32) {
    %c0_i32 = arith.constant 0 : i32
    %c0_i32_0 = arith.constant 0 : i32
    %c0_i32_1 = arith.constant 0 : i32
    return %c0_i32, %c0_i32_0 : i32, i32
  }
  func.func @transform_8(%arg0: i32, %arg1: i32) -> (i32, i32, i32, i32) {
    %c0_i32 = arith.constant 0 : i32
    %c0_i32_0 = arith.constant 0 : i32
    %c0_i32_1 = arith.constant 0 : i32
    return %arg0, %arg1, %c0_i32, %c0_i32_0 : i32, i32, i32, i32
  }
}

</mosaic_0001>

<bundles_post_ra>
// kernel: _lambda_.3
= control target key start
LH: loop header
LB: loop body
LE: loop exit
PB: predicated region body
PF: predicated region fallthrough
CT: control target
= control target key end

     0   :  { %s934_s29 = smov 0   ;;  %s936_s30 = smov 0   ;;  %s1027_s0 = inlined_call_operand.vmem [shape: f32[2,3,8,8], index: 0, kind: input, shape index: {}]   ;;  %s1028_s1 = inlined_call_operand.vmem [shape: f32[16,32], index: 1, kind: input, shape index: {}]   ;;  %s1029_s2 = inlined_call_operand.vmem [shape: f32[16,1], index: 2, kind: input, shape index: {}]   ;;  %s1030_s3 = inlined_call_operand.vmem [shape: f32[8,96], index: 3, kind: input, shape index: {}]   ;;  %s1031_s4 = inlined_call_operand.vmem [shape: f32[1,96], index: 4, kind: input, shape index: {}]   ;;  %s1032_s5 = inlined_call_operand.vmem [shape: f32[32,96], index: 5, kind: input, shape index: {}]   ;;  %s1033_s6 = inlined_call_operand.vmem [shape: f32[1,160], index: 6, kind: input, shape index: {}]   ;;  %s1034_s7 = inlined_call_operand.<no memory space> [shape: f32[1,1], index: 7, kind: input, shape index: {}]   ;;  %s1035_s8 = inlined_call_operand.vmem [shape: f32[2,3,8,1], index: 8, kind: output, shape index: {}]  }
   0x1   :  { %v13_v0 = vstv %s1034_s7  ;;  %s938_s9 = smov 0   ;;  %s940_s10 = smov 0  }
   0x2   :  { %14 = vst [vmem:[#allocation4] sm:$0x1] %v13_v0  ;;  %s942_s11 = smov 0  }
   0x3 LB: > { %s29_s7 = sadd.s32 1, %s869_s9  ;;  %s32_s12 = sadd.s32 1, %s873_s10  ;;  %s877_s11 = sphi %s942_s11, %s20_s11   ;;  %s873_s10 = sphi %s940_s10, %s1041_s10   ;;  %s869_s9 = sphi %s938_s9, %s1040_s9   ;;  %s865_s30 = sphi %s936_s30, %s1039_s30   ;;  %s861_s29 = sphi %s934_s29, %s1038_s29  }
   0x4   : > { %p30_p0 = scmp.ge.s32.totalorder %s29_s7, 3  ;;  %p740_p1 = scmp.ge.s32.totalorder %s877_s11, 1 }
   0x5   : > { %p301_p2 = scmp.lt.s32.totalorder %s877_s11, 7 }
   0x6   : > { %s1043_s7 = smov (%p30_p0, %s29_s7), 0  ;;  %s1045_s12 = smov (!%p30_p0, %s32_s12), %s873_s10 }
   0x7   : > { %p302_p3 = pnand %p740_p1, %p301_p2  ;;  %p34_p4 = scmp.ge.s32.totalorder %s1045_s12, 2 }
   0x8   : > { %p349_p5 = scmp.lt.s32.totalorder (!%p302_p3), %s865_s30, 1  ;;  %p351_p6 = scmp.lt.s32.totalorder (!%p302_p3), %s861_s29, 2 }
   0x9   : > { %s1047_s12 = smov (%p34_p4, %s1045_s12), 0  ;;  %305 = sbr.rel (%p302_p3) target bundleno = 874 (0x36a), region = 52 }
   0xa   : > { %1036 = sst [smem:[#allocation5_spill]] %s1047_s12  ;;  %p745_p7 = scmp.ne.s32.totalorder (!%p302_p3), %s861_s29, 0 }
  0x10   : > { %s1049_s30 = smov (!%p349_p5, %s865_s30), 1  ;;  %376 = sbr.rel (%p745_p7) target bundleno = 23 (0x17), region = 56 }
  0x11   : > { %s352_s13 = scalar_select %p351_p6, %s861_s29, 2 }
  0x12   : > { %s784_s14 = smul.u32 3, %s1049_s30  ;;  %s742_s15 = sshll.u32 %s1049_s30, 3  ;;  %vm378_vm0 = vcmask (!%p745_p7), 261120   ;;  %vm381_vm1 = vcmask (!%p745_p7), 7168  }
  0x13   : > { %s360_s18 = scalar_lea.vmem %s1028_s1, %s742_s15  ;;  %s364_s21 = scalar_lea.vmem %s1029_s2, %s742_s15 }
  0x14   : > { %s354_s22 = sadd.s32 %s784_s14, %s352_s13  ;;  %v377_v1 = vld [vmem:[%s360_s18] sm:$0xff] (!%p745_p7) }
  0x15   : > { %s741_s23 = sshll.u32 %s354_s22, 3  ;;  %v380_v2 = vld [vmem:[%s364_s21] sm:$0xff] (!%p745_p7)  ;;  %379 = vst.msk [vmem:[#allocation2] sm:$0xff] (!%p745_p7), %vm378_vm0, %v377_v1 }
  0x16   : > { %s356_s26 = scalar_lea.vmem %s1027_s0, %s741_s23  ;;  %s976_s12 = scalar_lea.vmem %s1035_s8, %s741_s23  ;;  %382 = vst.msk [vmem:[#allocation3] sm:$0xff] (!%p745_p7), %vm381_vm1, %v380_v2 }
  0x17 PF: > { %v482_v3 = vld [vmem:[%s1032_s5] sm:$0xff]  ;;  %v483_v4 = vld [vmem:[%s1032_s5 + $0x8] sm:$0xff]  ;;  %v879_v6 = vmov 0.0|0.0   ;;  %v880_v8 = vmov 0.0   ;;  %vm400_vm2 = vcmask 64512   ;;  %v484_v10 = vld [vmem:[%s1032_s5 + $0x10] sm:$0xff] }
  0x18   : > { %v386_v5 = vld [vmem:[%s1030_s3] sm:$0xff]  ;;  %778 = vmatprep.subr.bf16.mxu1 %v879_v6  ;;  %v779_v7 = vpack.c.bf16 %v483_v4, %v482_v3  ;;  %762 = vmatprep.subr.mxu0 %v880_v8  ;;  %v485_v11 = vld [vmem:[%s1032_s5 + $0x18] sm:$0xff]  ;;  %vm881_vm3 = vmmov 0   ;;  %s882_s23 = smov 96   ;;  %v883_v14 = vmov 0   ;;  %vm486_vm4 = vcmask 261120  }
  0x19   : > { %v385_v9 = vld [vmem:[%s356_s26] sm:$0xff]  ;;  %763 = vmatpush3.msra.mxu0 %v386_v5  ;;  %764 = vmatprep.mubr.msk.f32.mxu0 %vm881_vm3, %v880_v8  ;;  %v782_v13 = vpack.c.bf16 %v485_v11, %v484_v10  ;;  %s884_s24 = smov 32   ;;  %s885_s25 = smov 64   ;;  %v752_v50 = vld [vmem:[#allocation4] ss:$0 sm:$0xff]  ;;  %vm623_vm5 = vcmask 7168  }
  0x1a   : > { %v748_v12 = vld [vmem:[%s1033_s6] ss:$0 sm:$0xff]  ;;  %780 = vmatpush3.bf16.msra.mxu1 %v779_v7  ;;  %765 = vmatmul.mubr.msk.f32.vlgmr.msra.gmra.mrb[0].mxu0 %vm400_vm2, %v385_v9  ;;  %v751_v38 = vld [vmem:[%s1033_s6 + $0x1] ss:$0 sm:$0xff] }
  0x1b   : > { %781 = vmatprep.subr.bf16.mxu1 %v879_v6  ;;  %775 = vmatprep.mubr.msk.f32.mxu1 %vm881_vm3, %v880_v8  ;;  %v746_v23 = vld [vmem:[%s1031_s4] ss:$0 sm:$0xff] }
  0x1c   : > { %568 = vrot.lane.b32.xlu0 %v748_v12, %s882_s23  ;;  %v383_v16 = vld [vmem:[#allocation2] sm:$0xff] }
  0x1d   : > { %832 = vset.pattern.permute.xlu0 %v883_v14  ;;  %v384_v15 = vld [vmem:[#allocation3] sm:$0xff] }
  0x1e   : > { %783 = vmatpush3.bf16.msra.mxu1 %v782_v13 }
  0x20   : > { %390 = vperm.xlu0 %832, %v384_v15  }
  0x21   : > { %776 = vmatmul.mubr.msk.f32.vlgmr.msra.gmra.mrb[0].mxu1 %vm486_vm4, %v383_v16 }
  0x24   : > { %589 = vrot.lane.b32.xlu0 %v383_v16, %s884_s24 }
  0x8e   : > { %v569_v19 = vpop.permute.xlu0 %568 }
  0x9f   : > { %v391_v24 = vpop.permute.xlu0 %390 }
  0xa0   : > { %v399_v25 = vmul.f32 %v746_v23, %v391_v24 }
  0xa3   : > { %v590_v39 = vpop.permute.xlu0 %589 }
  0xed   : > { %v470_v17 = vpop.f32.mrb[0].mxu0 }
  0xee   : > { %v766_v18 = vpop.f32.mrb[1].mxu0  ;;  %v471_v26 = vadd.f32 %v470_v17, %v399_v25 }
  0xf0   : > { %v481_v27 = vadd.f32 %v748_v12, %v471_v26 }
  0xf4   : > { %v556_v20 = vpop.f32.mrb[0].mxu1 }
  0xf5   : > { %v777_v21 = vpop.f32.mrb[1].mxu1  ;;  %v571_v22 = vadd.f32 %v569_v19, %v556_v20  ;;  %v561_v28 = vadd.f32 %v556_v20, %v481_v27 }
  0xf7   : > { %573 = vrot.lane.b32.xlu1 %v571_v22, %s885_s25  ;;  %v750_v29 = vmul.f32 -1.442695, %v561_v28 }
  0xf9   : > { %833 = vpow2.f32 %v750_v29 }
 0x103   : > { %v834_v30 = vpop.eup %833 }
 0x104   : > { %v565_v31 = vadd.f32 1.0, %v834_v30 }
 0x106   : > { %835 = vrcp.f32 %v565_v31 }
 0x110   : > { %v836_v32 = vpop.eup %835 }
 0x111   : > { %v583_v40 = vsub.f32 1.0, %v836_v32  ;;  %v592_v42 = vmul.f32 %v836_v32, %v590_v39 }
 0x169   : > { %v574_v33 = vpop.permute.xlu1 %573 }
 0x16a   : > { %v576_v34 = vmul.f32 %v836_v32, %v574_v33 }
 0x16c   : > { %578 = vrot.lane.b32.xlu1 %v576_v34, %s885_s25 }
 0x1de   : > { %v579_v35 = vpop.permute.xlu1 %578 }
 0x1df   : > { %v581_v36 = vadd.f32 %v579_v35, %v481_v27 }
 0x1e1   : > { %837 = vtanh.f32 %v581_v36 }
 0x1eb   : > { %v838_v37 = vpop.eup %837 }
 0x1ec   : > { %585 = vrot.lane.b32.xlu1 %v838_v37, %s882_s23 }
 0x1f0   : > { %599 = vrot.lane.b32.xlu1 %v751_v38, %s884_s24 }
 0x25e   : > { %v586_v41 = vpop.permute.xlu1 %585 }
 0x25f   : > { %v588_v43 = vmul.f32 %v586_v41, %v583_v40 }
 0x261   : > { %v593_v44 = vadd.f32 %v592_v42, %v588_v43 }
 0x262   : > { %v600_v45 = vpop.permute.xlu1 %599 }
 0x263   : > { %v602_v46 = vmul.f32 %v600_v45, %v593_v44 }
 0x265   : > { %604 = vrot.lane.b32.xlu0 %v602_v46, %s882_s23 }
 0x269   : > { %619 = vrot.lane.b32.xlu0 %v593_v44, %s882_s23 }
 0x2d7   : > { %v605_v47 = vpop.permute.xlu0 %604 }
 0x2d8   : > { %v607_v48 = vsel %vm486_vm4, %v605_v47, 0.0 }
 0x2d9   : > { %608 = vadd.xlane.f32.xlu1 %v607_v48 }
 0x2db   : > { %v620_v49 = vpop.permute.xlu0 %619 }
 0x2dc   : > { %622 = vst.msk [vmem:[#allocation2] sm:$0xff] %vm486_vm4, %v620_v49 }
 0x366   : > { %v609_v51 = vpop.xlane.xlu1 %608 }
 0x367   : > { %v617_v52 = vadd.f32 %v752_v50, %v609_v51 }
 0x369   : > { %624 = vst.msk [vmem:[#allocation3] sm:$0xff] %vm623_vm5, %v617_v52  ;;  %625 = vst.msk [vmem:[%s976_s12] sm:$0xff] %vm623_vm5, %v617_v52 }
 0x36a PF: > { %s20_s11 = sadd.s32 1, %s877_s11   ;;  %s1037_s13 = sld [smem:[#allocation5_spill]] }
 0x36b   : > { %p17_p8 = scmp.ge.s32.totalorder %s20_s11, 8   ;;  %s1038_s29 = smov %s869_s9 }
 0x36c   : > { %s1039_s30 = smov %s873_s10  ;;  %s1040_s9 = smov %s1043_s7 }
 0x36d   :  { %19 = sbr.rel (!%p17_p8) target bundleno = 3 (0x3), region = 92 }
 0x370   : > { %s1041_s10 = smov %s1037_s13 }

// kernel: _lambda_.2
= control target key start
LH: loop header
LB: loop body
LE: loop exit
PB: predicated region body
PF: predicated region fallthrough
CT: control target
= control target key end

     0   :  { %s1179_s15 = smov 0   ;;  %s1181_s16 = smov 0   ;;  %s1305_s0 = inlined_call_operand.vmem [shape: f32[2,4,8,12], index: 0, kind: input, shape index: {}]   ;;  %s1306_s1 = inlined_call_operand.vmem [shape: f32[8,8], index: 1, kind: input, shape index: {}]   ;;  %s1307_s2 = inlined_call_operand.vmem [shape: f32[12,160], index: 2, kind: input, shape index: {}]   ;;  %s1308_s3 = inlined_call_operand.vmem [shape: f32[1,160], index: 3, kind: input, shape index: {}]   ;;  %s1309_s4 = inlined_call_operand.vmem [shape: f32[32,96], index: 4, kind: input, shape index: {}]   ;;  %s1310_s5 = inlined_call_operand.vmem [shape: f32[32,96], index: 5, kind: input, shape index: {}]   ;;  %s1311_s6 = inlined_call_operand.vmem [shape: f32[1,160], index: 6, kind: input, shape index: {}]   ;;  %s1312_s7 = inlined_call_operand.vmem [shape: f32[1,64], index: 7, kind: input, shape index: {}]   ;;  %s1313_s8 = inlined_call_operand.<no memory space> [shape: f32[1,1], index: 8, kind: input, shape index: {}]   ;;  %s1314_s9 = inlined_call_operand.vmem [shape: f32[16,32], index: 9, kind: output, shape index: {0}]   ;;  %s1315_s10 = inlined_call_operand.vmem [shape: f32[16,1], index: 10, kind: output, shape index: {1}]  }
   0x1   :  { %v16_v0 = vstv %s1313_s8  ;;  %s1183_s17 = smov 0   ;;  %s1185_s18 = smov 0  }
   0x2   :  { %17 = vst [vmem:[#allocation2] sm:$0x1] %v16_v0  ;;  %s1187_s19 = smov 0  }
   0x3 LB: > { %s32_s8 = sadd.s32 1, %s1102_s17  ;;  %s35_s20 = sadd.s32 1, %s1106_s18  ;;  %s1110_s19 = sphi %s1187_s19, %s23_s19   ;;  %s1106_s18 = sphi %s1185_s18, %s1319_s18   ;;  %s1102_s17 = sphi %s1183_s17, %s1318_s17   ;;  %s1098_s16 = sphi %s1181_s16, %s1317_s16   ;;  %s1094_s15 = sphi %s1179_s15, %s1316_s15  }
   0x4   : > { %p33_p0 = scmp.ge.s32.totalorder %s32_s8, 4  ;;  %p937_p1 = scmp.ge.s32.totalorder %s1110_s19, 1 }
   0x5   : > { %p334_p2 = scmp.lt.s32.totalorder %s1110_s19, 9 }
   0x6   : > { %s1321_s8 = smov (%p33_p0, %s32_s8), 0  ;;  %s1323_s20 = smov (!%p33_p0, %s35_s20), %s1106_s18 }
   0x7   : > { %p335_p3 = pnand %p937_p1, %p334_p2  ;;  %p37_p4 = scmp.ge.s32.totalorder %s1323_s20, 2 }
   0x8   : > { %p378_p5 = scmp.lt.s32.totalorder (!%p335_p3), %s1098_s16, 1  ;;  %p380_p6 = scmp.lt.s32.totalorder (!%p335_p3), %s1094_s15, 3 }
   0x9   : > { %s1325_s20 = smov (%p37_p4, %s1323_s20), 0  ;;  %338 = sbr.rel (%p335_p3) target bundleno = 1358 (0x54e), region = 56 }
   0xa   : > { %p942_p7 = scmp.ne.s32.totalorder (!%p335_p3), %s1094_s15, 0 }
  0x10   : > { %s1327_s16 = smov (!%p378_p5, %s1098_s16), 1  ;;  %397 = sbr.rel (%p942_p7) target bundleno = 23 (0x17), region = 60 }
  0x11   : > { %s381_s21 = scalar_select %p380_p6, %s1094_s15, 3 }
  0x12   : > { %s938_s22 = sshll.u32 %s1327_s16, 2  ;;  %s940_s23 = sshll.u32 %s1327_s16, 3  ;;  %vm398_vm0 = vcmask (!%p942_p7), 261120   ;;  %vm400_vm1 = vcmask (!%p942_p7), 7168   ;;  %v1112_v1 = vmov (!%p942_p7), 0.0  }
  0x13   : > { %s383_s24 = sadd.s32 %s938_s22, %s381_s21  ;;  %s1212_s27 = scalar_lea.vmem %s1314_s9, %s940_s23 }
  0x14   : > { %s939_s28 = sshll.u32 %s383_s24, 3  ;;  %s1217_s11 = scalar_lea.vmem %s1315_s10, %s940_s23  ;;  %399 = vst.msk [vmem:[%s1212_s27] sm:$0xff] (!%p942_p7), %vm398_vm0, %v1112_v1 }
  0x15   : > { %s385_s14 = scalar_lea.vmem %s1305_s0, %s939_s28  ;;  %401 = vst.msk [vmem:[%s1217_s11] sm:$0xff] (!%p942_p7), %vm400_vm1, %v1112_v1 }
  0x17 PF: > { %v406_v2 = vld [vmem:[%s1307_s2 + $0x8] sm:$0xff]  ;;  %v408_v3 = vld [vmem:[%s1307_s2 + $0x18] sm:$0xf]  ;;  %vm432_vm2 = vcmask 1043456   ;;  %v405_v4 = vld [vmem:[%s1307_s2] sm:$0xff]  ;;  %v416_v5 = vlaneseq  ;;  %vm1113_vm3 = vmmov 1  }
  0x18   : > { %v994_v6 = vpack.c.bf16 %v408_v3, %v406_v2  ;;  %vm995_vm4 = vmpackc.low %vm432_vm2, %vm1113_vm3  ;;  %v407_v7 = vld [vmem:[%s1307_s2 + $0x10] sm:$0xf]  ;;  %v1114_v9 = vmov 0.0   ;;  %v1115_v10 = vmov 0   ;;  %v409_v13 = vld [vmem:[%s1308_s3] sm:$0x3] }
  0x19   : > { %v997_v8 = vpack.c.bf16 %v407_v7, %v405_v4  ;;  %503 = vmatprep.mubr.f32.mxu0 %v1114_v9  ;;  %1061 = vset.pattern.permute.xlu0 %v1115_v10  ;;  %v417_v12 = vshrl.u32 %v416_v5, 7  ;;  %v402_v14 = vld [vmem:[%s385_s14] sm:$0xff]  ;;  %vm428_vm5 = vcmask 97280   ;;  %vm1116_vm6 = vmmov 0   ;;  %s1117_s16 = smov 96   ;;  %v610_v33 = vld [vmem:[%s1309_s4 + $0x8] sm:$0xff] }
  0x1a   : > { %996 = vmatprep.subr.msk.bf16.mxu0 %vm995_vm4, %v994_v6  ;;  %967 = vmatprep.subr.mxu1 %v1114_v9  ;;  %v510_v17 = vld [vmem:[%s1311_s6] sm:$0x3]  ;;  %vm529_vm7 = vcmask 64512   ;;  %v1118_v35 = vmov 0.0|0.0   ;;  %v694_v37 = vld [vmem:[%s1310_s5 + $0x8] sm:$0xff]  ;;  %v611_v38 = vld [vmem:[%s1309_s4 + $0x10] sm:$0xff] }
  0x1b   : > { %999 = vmatpush1.bf16.msk.msra.mxu0 %vm995_vm4, %v997_v8  ;;  %v422_v15 = vsub.s32 1, %v417_v12  ;;  %969 = vmatprep.mubr.msk.f32.mxu1 %vm1116_vm6, %v1114_v9  ;;  %v418_v19 = vsub.s32 0, %v417_v12  ;;  %v524_v30 = vld [vmem:[%s1306_s1] sm:$0xff]  ;;  %v612_v39 = vld [vmem:[%s1309_s4 + $0x18] sm:$0xff]  ;;  %v695_v42 = vld [vmem:[%s1310_s5 + $0x10] sm:$0xff]  ;;  %s1119_s25 = smov 64  }
  0x1c   : > { %v403_v11 = vld [vmem:[%s1217_s11] sm:$0xff]  ;;  %1006 = vmatprep.subr.bf16.mxu0 %v1118_v35  ;;  %v1004_v41 = vpack.c.bf16 %v612_v39, %v611_v38  ;;  %v696_v43 = vld [vmem:[%s1310_s5 + $0x18] sm:$0xff]  ;;  %vm613_vm8 = vcmask 261120   ;;  %s1120_s26 = smov 32   ;;  %vm830_vm9 = vcmask 7168  }
  0x1d   : > { %412 = vperm.xlu0 %1061, %v403_v11   ;;  %v423_v16 = vrot.slane %v409_v13, %v422_v15  ;;  %v519_v18 = vrot.slane %v510_v17, %v422_v15  ;;  %v419_v20 = vrot.slane %v409_v13, %v418_v19  ;;  %v515_v24 = vrot.slane %v510_v17, %v418_v19  ;;  %v609_v32 = vld [vmem:[%s1309_s4] sm:$0xff] }
  0x1e   : > { %945 = vmatmul.mubr.msk.f32.vlgmr.msra.gmra.mrb[0].mxu0 %vm428_vm5, %v402_v14  ;;  %v693_v34 = vld [vmem:[%s1310_s5] sm:$0xff]  ;;  %v1001_v36 = vpack.c.bf16 %v610_v33, %v609_v32  ;;  %v1010_v44 = vpack.c.bf16 %v696_v43, %v695_v42 }
  0x1f   : > { %991 = vmatprep.mubr.msk.f32.mxu0 %vm1116_vm6, %v1114_v9  ;;  %v1007_v40 = vpack.c.bf16 %v694_v37, %v693_v34  ;;  %v404_v45 = vld [vmem:[%s1212_s27] sm:$0xff] }
  0x20   : > { %v951_v46 = vld [vmem:[%s1312_s7] ss:$0 sm:$0xff] }
  0x21   : > { %1008 = vmatpush3.bf16.msra.mxu0 %v1007_v40 }
  0x22   : > { %1009 = vmatprep.subr.bf16.mxu0 %v1118_v35 }
  0x25   : > { %1011 = vmatpush3.bf16.msra.mxu0 %v1010_v44 }
  0x28   : > { %992 = vmatmul.mubr.msk.f32.vlgmr.msra.gmra.mrb[2].mxu0 %vm613_vm8, %v404_v45 }
  0x9c   : > { %v413_v21 = vpop.permute.xlu0 %412 }
  0x9d   : > { %v426_v22 = vmul.f32 %v419_v20, %v413_v21  ;;  %v427_v23 = vmul.f32 %v423_v16, %v413_v21  ;;  %v952_v20 = vld [vmem:[#allocation2] ss:$0 sm:$0xff] }
  0xf1   : > { %v505_v25 = vpop.f32.mrb[0].mxu0 }
  0xf2   : > { %v506_v26 = vadd.f32 %v505_v25, %v426_v22  ;;  %v507_v27 = vpop.f32.mrb[1].mxu0 }
  0xf3   : > { %v508_v28 = vadd.f32 %v507_v27, %v427_v23 }
  0xf4   : > { %v522_v29 = vadd.f32 %v515_v24, %v506_v26 }
  0xf5   : > { %v523_v31 = vadd.f32 %v519_v18, %v508_v28 }
  0xf6   : > { %526 = vrot.lane.b32.xlu0 %v522_v29, %s1117_s16  ;;  %968 = vmatpush3.msra.mxu1 %v522_v29 }
  0xf7   : > { %970 = vmatmul.mubr.msk.f32.vlgmr.msra.gmra.mrb[0].mxu1 %vm529_vm7, %v524_v30  ;;  %1000 = vmatprep.subr.bf16.mxu1 %v1118_v35 }
  0xf8   : > { %980 = vmatprep.mubr.msk.f32.mxu1 %vm1116_vm6, %v1114_v9  ;;  %1002 = vmatpush3.bf16.msra.mxu1 %v1001_v36 }
  0xf9   : > { %1003 = vmatprep.subr.bf16.mxu1 %v1118_v35 }
  0xfa   : > { %787 = vrot.lane.b32.xlu0 %v951_v46, %s1119_s25 }
  0xfb   : > { %v766_v55 = vpop.f32.mrb[2].mxu0 }
  0xfc   : > { %1005 = vmatpush3.bf16.msra.mxu1 %v1004_v41  ;;  %v993_v56 = vpop.f32.mrb[3].mxu0 }
 0x168   : > { %v527_v47 = vpop.permute.xlu0 %526 }
 0x16c   : > { %v788_v3 = vpop.permute.xlu0 %787 }
 0x16d   : > { %v790_v4 = vadd.f32 %v788_v3, %v766_v55 }
 0x1ca   : > { %v599_v48 = vpop.f32.mrb[0].mxu1 }
 0x1cb   : > { %v600_v49 = vadd.f32 %v599_v48, %v527_v47  ;;  %v971_v50 = vpop.f32.mrb[1].mxu1 }
 0x1cd   : > { %v947_v51 = vmul.f32 -1.442695, %v600_v49 }
 0x1cf   : > { %1062 = vpow2.f32 %v947_v51 }
 0x1d9   : > { %v1063_v52 = vpop.eup %1062 }
 0x1da   : > { %v606_v53 = vadd.f32 1.0, %v1063_v52 }
 0x1dc   : > { %1064 = vrcp.f32 %v606_v53 }
 0x1e6   : > { %v1065_v54 = vpop.eup %1064 }
 0x1e7   : > { %981 = vmatmul.mubr.msk.f32.vlgmr.msra.gmra.mrb[2].mxu1 %vm613_vm8, %v1065_v54 }
 0x2ba   : > { %v683_v57 = vpop.f32.mrb[2].mxu1 }
 0x2bb   : > { %688 = vrot.lane.b32.xlu1 %v683_v57, %s1119_s25  ;;  %v982_v58 = vpop.f32.mrb[3].mxu1 }
 0x2bf   : > { %772 = vrot.lane.b32.xlu1 %v766_v55, %s1119_s25 }
 0x32d   : > { %v689_v59 = vpop.permute.xlu1 %688 }
 0x32e   : > { %v692_v60 = vadd.f32 %v689_v59, %v523_v31  ;;  %v691_v61 = vadd.f32 %v689_v59, %v522_v29 }
 0x331   : > { %v773_v62 = vpop.permute.xlu1 %772 }
 0x332   : > { %v775_v63 = vadd.f32 %v773_v62, %v691_v61 }
 0x334   : > { %v950_v0 = vmul.f32 -1.442695, %v775_v63 }
 0x336   : > { %1066 = vpow2.f32 %v950_v0 }
 0x340   : > { %v1067_v1 = vpop.eup %1066 }
 0x341   : > { %v779_v2 = vadd.f32 1.0, %v1067_v1 }
 0x343   : > { %1068 = vrcp.f32 %v779_v2 }
 0x34d   : > { %v1069_v5 = vpop.eup %1068 }
 0x34e   : > { %v791_v6 = vmul.f32 %v1069_v5, %v790_v4  ;;  %v798_v11 = vsub.f32 1.0, %v1069_v5 }
 0x350   : > { %793 = vrot.lane.b32.xlu1 %v791_v6, %s1119_s25 }
 0x354   : > { %804 = vrot.lane.b32.xlu1 %v404_v45, %s1117_s16 }
 0x3c2   : > { %v794_v7 = vpop.permute.xlu1 %793 }
 0x3c3   : > { %v796_v8 = vadd.f32 %v794_v7, %v692_v60 }
 0x3c5   : > { %1070 = vtanh.f32 %v796_v8 }
 0x3c6   : > { %v805_v10 = vpop.permute.xlu1 %804 }
 0x3c7   : > { %v807_v13 = vmul.f32 %v1069_v5, %v805_v10 }
 0x3cf   : > { %v1071_v9 = vpop.eup %1070 }
 0x3d0   : > { %800 = vrot.lane.b32.xlu0 %v1071_v9, %s1117_s16 }
 0x442   : > { %v801_v12 = vpop.permute.xlu0 %800 }
 0x443   : > { %v803_v14 = vmul.f32 %v801_v12, %v798_v11 }
 0x445   : > { %v808_v15 = vadd.f32 %v807_v13, %v803_v14 }
 0x447   : > { %v809_v16 = vmul.f32 %v808_v15, %v788_v3 }
 0x449   : > { %811 = vrot.lane.b32.xlu0 %v809_v16, %s1120_s26 }
 0x44d   : > { %826 = vrot.lane.b32.xlu0 %v808_v15, %s1120_s26 }
 0x4bb   : > { %v812_v17 = vpop.permute.xlu0 %811 }
 0x4bc   : > { %v814_v18 = vsel %vm613_vm8, %v812_v17, 0.0 }
 0x4bd   : > { %815 = vadd.xlane.f32.xlu1 %v814_v18 }
 0x4bf   : > { %v827_v19 = vpop.permute.xlu0 %826 }
 0x4c0   : > { %829 = vst.msk [vmem:[%s1212_s27] sm:$0xff] %vm613_vm8, %v827_v19 }
 0x54a   : > { %v816_v21 = vpop.xlane.xlu1 %815 }
 0x54b   : > { %v824_v22 = vadd.f32 %v952_v20, %v816_v21 }
 0x54d   : > { %831 = vst.msk [vmem:[%s1217_s11] sm:$0xff] %vm830_vm9, %v824_v22 }
 0x54e PF: > { %s23_s19 = sadd.s32 1, %s1110_s19   ;;  %s1316_s15 = smov %s1102_s17 }
 0x54f   : > { %p20_p8 = scmp.ge.s32.totalorder %s23_s19, 10   ;;  %s1317_s16 = smov %s1106_s18 }
 0x550   : > { %s1318_s17 = smov %s1321_s8  ;;  %s1319_s18 = smov %s1325_s20 }
 0x551   :  { %22 = sbr.rel (!%p20_p8) target bundleno = 3 (0x3), region = 102 }

</bundles_post_ra>
